<compile_context>
chip_gen: v5e
topology: v5e:2x2
jax: 0.10.0
libtpu: 0.0.40
codegen_flags: <defaults>
</compile_context>

<pallas_src>
import jax
import jax.numpy as jnp
from jax.experimental import pallas as pl
from jax.experimental.pallas import tpu as pltpu

_LANE = 128      # lane width (last dim)
_SUBLANE = 16    # sublane-friendly batch multiple (covers f32 (8,128) and bf16 (16,128))
_VMEM_BUDGET = 48 << 20   # conservative: fits v7x's 64 MiB VMEM, trivially v5e/v6e


def _round_up(n, m):
    return ((n + m - 1) // m) * m


def mlp_kernel(x_ref, w1_ref, b1_ref, w2_ref, b2_ref, o_ref):
    # Fused Linear -> ReLU -> Linear on one VMEM-resident batch tile.
    # Matmuls use the operand dtype (f32 or bf16) with f32 accumulation;
    # bias-add and ReLU stay in f32 (v5e has no bf16 VPU).
    h = jnp.dot(x_ref[...], w1_ref[...], preferred_element_type=jnp.float32)
    h = jnp.maximum(h + b1_ref[...], 0.0)          # f32 bias + ReLU
    h = h.astype(w2_ref.dtype)                     # match MXU operand dtype for 2nd matmul
    y = jnp.dot(h, w2_ref[...], preferred_element_type=jnp.float32)
    o_ref[...] = (y + b2_ref[...]).astype(o_ref.dtype)


def prepare_params(w1, b1, w2, b2):
    """One-time layout prep (call at model init, reuse for every forward).

    w1: (inp, hid)   b1: (hid,) or (1, hid)
    w2: (hid, out)   b2: (out,) or (1, out)

    Pads the hidden dim to a lane multiple (128) so the intermediate and both
    MXU operands are lane-dense; pads out only when out >= 128. Zero padding is
    exact: padded hidden columns have 0 weight + 0 bias, ReLU(0)=0, padded W2
    rows are 0, so results are unchanged. Biases are kept in f32.
    """
    if w1.dtype != w2.dtype:
        raise ValueError("w1 and w2 must share a dtype (float32 or bfloat16).")
    inp, hid = w1.shape
    out = w2.shape[1]
    b1 = jnp.asarray(b1, jnp.float32).reshape(1, hid)
    b2 = jnp.asarray(b2, jnp.float32).reshape(1, out)

    hid_p = _round_up(hid, _LANE)
    out_p = _round_up(out, _LANE) if out >= _LANE else out   # small out: unpadded store

    return dict(
        w1=jnp.pad(w1, ((0, 0), (0, hid_p - hid))),
        b1=jnp.pad(b1, ((0, 0), (0, hid_p - hid))),
        w2=jnp.pad(w2, ((0, hid_p - hid), (0, out_p - out))),
        b2=jnp.pad(b2, ((0, 0), (0, out_p - out))),
        inp=inp, hid=hid, out=out, hid_p=hid_p, out_p=out_p,
    )


def ai_model_forward(x, params, *, tile_m=None):
    """y = relu(x @ W1 + b1) @ W2 + b2, fused in a single Pallas kernel.

    x: (B, inp); params from prepare_params (pre-padded, cached — never re-padded
    per call). Output dtype follows x.dtype; accumulation / bias / ReLU are f32.
    """
    B, inp = x.shape
    if inp != params["inp"]:
        raise ValueError(f"x has {inp} features, weights expect {params['inp']}.")
    if x.dtype != params["w1"].dtype:
        raise ValueError("x and the weights must share a dtype (no silent promotion).")

    w1_p, b1_p, w2_p, b2_p = params["w1"], params["b1"], params["w2"], params["b2"]
    hid_p, out_p, out = params["hid_p"], params["out_p"], params["out"]

    io_item = jnp.dtype(x.dtype).itemsize
    w_item = jnp.dtype(w1_p.dtype).itemsize

    # --- batch tiling: >= 2 "parallel" tiles when the batch allows it (v7x
    # megacore), capped at 512 rows/tile; tiny batches run in one grid step.
    B_p = _round_up(B, _SUBLANE)
    if tile_m is None:
        if B_p >= 2 * _SUBLANE:
            tile_m = min(512, _round_up(pl.cdiv(B_p, 2), _SUBLANE))
        else:
            tile_m = B_p
    tile_m = min(max(_SUBLANE, _round_up(tile_m, _SUBLANE)), B_p)

    def vmem_est(tm):
        return (2 * tm * inp * io_item                       # x tile (double-buffered)
                + 2 * tm * out_p * io_item                   # out tile (double-buffered)
                + (inp * hid_p + hid_p * out_p) * w_item     # weights (Buffered(1))
                + (hid_p + out_p) * 4                        # f32 biases
                + tm * hid_p * (4 + w_item))                 # f32 intermediate + cast copy

    while tile_m > _SUBLANE and vmem_est(tile_m) > _VMEM_BUDGET:
        tile_m = _round_up(tile_m // 2, _SUBLANE)
    # TODO(synk): if the resident weights alone exceed the VMEM budget (very large
    # hid/out), add a hidden-dim grid axis ("arbitrary") with an f32 VMEM accumulator.

    B_pad = _round_up(B_p, tile_m)
    x_p = x if B_pad == B else jnp.pad(x, ((0, B_pad - B), (0, 0)))

    grid = (B_pad // tile_m,)
    resident = dict(pipeline_mode=pl.Buffered(buffer_count=1))  # constant blocks: single buffer

    cost = pl.CostEstimate(
        flops=2 * B_pad * (inp * hid_p + hid_p * out_p),
        transcendentals=0,
        bytes_accessed=(B_pad * inp * io_item + B_pad * out_p * io_item
                        + (inp * hid_p + hid_p * out_p) * w_item + (hid_p + out_p) * 4),
    )

    y_p = pl.pallas_call(
        mlp_kernel,
        out_shape=jax.ShapeDtypeStruct((B_pad, out_p), x.dtype),
        grid_spec=pltpu.PrefetchScalarGridSpec(
            num_scalar_prefetch=0,
            grid=grid,
            in_specs=[
                pl.BlockSpec((tile_m, inp), lambda i: (i, 0)),               # x: batch-tiled
                pl.BlockSpec((inp, hid_p), lambda i: (0, 0), **resident),    # W1: resident
                pl.BlockSpec((1, hid_p), lambda i: (0, 0), **resident),      # b1: resident f32
                pl.BlockSpec((hid_p, out_p), lambda i: (0, 0), **resident),  # W2: resident
                pl.BlockSpec((1, out_p), lambda i: (0, 0), **resident),      # b2: resident f32
            ],
            out_specs=pl.BlockSpec((tile_m, out_p), lambda i: (i, 0)),
        ),
        compiler_params=pltpu.CompilerParams(
            dimension_semantics=("parallel",),   # batch tiles shard across TCs on v7x
            vmem_limit_bytes=int(min(64 << 20, max(32 << 20, 2 * vmem_est(tile_m)))),
        ),
        cost_estimate=cost,
    )(x_p, w1_p, b1_p, w2_p, b2_p)

    if B_pad != B or out_p != out:
        y_p = y_p[:B, :out]
    return y_p


def reference_forward(x, w1, b1, w2, b2):
    return jnp.maximum(x @ w1 + b1, 0.0) @ w2 + b2


if __name__ == "__main__":
    # Small shapes consistent with AIModel(inp=32, hid=64, out=16), batch=16.
    B, inp, hid, out = 16, 32, 64, 16

    key = jax.random.PRNGKey(0)
    k_x, k_w1, k_b1, k_w2, k_b2 = jax.random.split(key, 5)

    # Deterministic init mimicking nn.Linear's U(-1/sqrt(fan_in), 1/sqrt(fan_in)).
    bound1 = 1.0 / (inp ** 0.5)
    bound2 = 1.0 / (hid ** 0.5)
    x = jax.random.normal(k_x, (B, inp), dtype=jnp.float32)
    w1 = jax.random.uniform(k_w1, (inp, hid), jnp.float32, -bound1, bound1)
    b1 = jax.random.uniform(k_b1, (hid,), jnp.float32, -bound1, bound1)
    w2 = jax.random.uniform(k_w2, (hid, out), jnp.float32, -bound2, bound2)
    b2 = jax.random.uniform(k_b2, (out,), jnp.float32, -bound2, bound2)

    y_ref = reference_forward(x, w1, b1, w2, b2)

    # f32 path: pre-pad weights once, then run the fused kernel.
    params = prepare_params(w1, b1, w2, b2)
    y = ai_model_forward(x, params)
    jax.block_until_ready(y)
    assert y.shape == (B, out)
    assert jnp.allclose(y, y_ref, atol=1e-5, rtol=1e-5), "f32 mismatch vs reference"

    # jit-wrapped path (cached padded weights closed over; nothing re-padded per call).
    y_jit = jax.jit(lambda xx: ai_model_forward(xx, params))(x)
    jax.block_until_ready(y_jit)
    assert jnp.allclose(y_jit, y_ref, atol=1e-5, rtol=1e-5), "jit mismatch vs reference"

    # bf16 MXU-operand path (f32 accumulation / bias / ReLU): looser tolerance.
    params_bf16 = prepare_params(w1.astype(jnp.bfloat16), b1, w2.astype(jnp.bfloat16), b2)
    y_bf16 = ai_model_forward(x.astype(jnp.bfloat16), params_bf16)
    jax.block_until_ready(y_bf16)
    assert y_bf16.shape == (B, out)
    assert jnp.allclose(y_bf16.astype(jnp.float32), y_ref, atol=2e-1, rtol=2e-1), \
        "bf16 mismatch vs reference"

    print("KERNEL_OK")
</pallas_src>

<mosaic_0001>
module attributes {stable_mosaic.version = 11 : i64} {
  func.func @mlp_kernel(%arg0: i32, %arg1: memref<16x32xf32, #tpu.memory_space<vmem>>, %arg2: memref<32x128xf32, #tpu.memory_space<vmem>>, %arg3: memref<1x128xf32, #tpu.memory_space<vmem>>, %arg4: memref<128x16xf32, #tpu.memory_space<vmem>>, %arg5: memref<1x16xf32, #tpu.memory_space<vmem>>, %arg6: memref<16x16xf32, #tpu.memory_space<vmem>>) attributes {dimension_semantics = [#tpu.dimension_semantics<parallel>], iteration_bounds = array<i64: 1>, scalar_prefetch = 0 : i64, scratch_operands = 0 : i64, tpu.core_type = #tpu.core_type<tc>, window_params = [{transform_indices = @transform_0, window_bounds = array<i64: 16, 32>}, {pipeline_mode = #tpu.pipeline_mode<synchronous>, transform_indices = @transform_1, window_bounds = array<i64: 32, 128>}, {pipeline_mode = #tpu.pipeline_mode<synchronous>, transform_indices = @transform_2, window_bounds = array<i64: 1, 128>}, {pipeline_mode = #tpu.pipeline_mode<synchronous>, transform_indices = @transform_3, window_bounds = array<i64: 128, 16>}, {pipeline_mode = #tpu.pipeline_mode<synchronous>, transform_indices = @transform_4, window_bounds = array<i64: 1, 16>}, {transform_indices = @transform_5, window_bounds = array<i64: 16, 16>}]} {
    %c0 = arith.constant 0 : index
    %c0_0 = arith.constant 0 : index
    %0 = vector.load %arg1[%c0, %c0_0] : memref<16x32xf32, #tpu.memory_space<vmem>>, vector<16x32xf32>
    %c0_1 = arith.constant 0 : index
    %c0_2 = arith.constant 0 : index
    %1 = vector.load %arg2[%c0_1, %c0_2] : memref<32x128xf32, #tpu.memory_space<vmem>>, vector<32x128xf32>
    %cst = arith.constant dense<0.000000e+00> : vector<16x128xf32>
    %2 = tpu.matmul %0, %1, %cst {dimension_numbers = #tpu.dot_dimension_numbers<[1], [0], [0], [1], [0, 0, 1, 1], [], []>} : vector<16x32xf32>, vector<32x128xf32>, vector<16x128xf32> -> vector<16x128xf32>
    %c0_3 = arith.constant 0 : index
    %c0_4 = arith.constant 0 : index
    %3 = vector.load %arg3[%c0_3, %c0_4] : memref<1x128xf32, #tpu.memory_space<vmem>>, vector<1x128xf32>
    %4 = vector.broadcast %3 : vector<1x128xf32> to vector<16x128xf32>
    %5 = arith.addf %2, %4 : vector<16x128xf32>
    %cst_5 = arith.constant 0.000000e+00 : f32
    %6 = vector.broadcast %cst_5 : f32 to vector<16x128xf32>
    %7 = arith.maximumf %5, %6 : vector<16x128xf32>
    %c0_6 = arith.constant 0 : index
    %c0_7 = arith.constant 0 : index
    %8 = vector.load %arg4[%c0_6, %c0_7] : memref<128x16xf32, #tpu.memory_space<vmem>>, vector<128x16xf32>
    %cst_8 = arith.constant dense<0.000000e+00> : vector<16x16xf32>
    %9 = tpu.matmul %7, %8, %cst_8 {dimension_numbers = #tpu.dot_dimension_numbers<[1], [0], [0], [1], [0, 0, 1, 1], [], []>} : vector<16x128xf32>, vector<128x16xf32>, vector<16x16xf32> -> vector<16x16xf32>
    %c0_9 = arith.constant 0 : index
    %c0_10 = arith.constant 0 : index
    %10 = vector.load %arg5[%c0_9, %c0_10] : memref<1x16xf32, #tpu.memory_space<vmem>>, vector<1x16xf32>
    %11 = vector.broadcast %10 : vector<1x16xf32> to vector<16x16xf32>
    %12 = arith.addf %9, %11 : vector<16x16xf32>
    %c0_11 = arith.constant 0 : index
    %c0_12 = arith.constant 0 : index
    %13 = vector.load %arg6[%c0_11, %c0_12] : memref<16x16xf32, #tpu.memory_space<vmem>>, vector<16x16xf32>
    tpu.vector_store %arg6[%c0_11, %c0_12], %12 {strides = array<i32>} : memref<16x16xf32, #tpu.memory_space<vmem>>, vector<16x16xf32>,
    return
  }
  func.func @transform_0(%arg0: i32) -> (i32, i32) {
    %c0_i32 = arith.constant 0 : i32
    %c0_i32_0 = arith.constant 0 : i32
    return %arg0, %c0_i32 : i32, i32
  }
  func.func @transform_1(%arg0: i32) -> (i32, i32) {
    %c0_i32 = arith.constant 0 : i32
    %c0_i32_0 = arith.constant 0 : i32
    %c0_i32_1 = arith.constant 0 : i32
    return %c0_i32, %c0_i32_0 : i32, i32
  }
  func.func @transform_2(%arg0: i32) -> (i32, i32) {
    %c0_i32 = arith.constant 0 : i32
    %c0_i32_0 = arith.constant 0 : i32
    %c0_i32_1 = arith.constant 0 : i32
    return %c0_i32, %c0_i32_0 : i32, i32
  }
  func.func @transform_3(%arg0: i32) -> (i32, i32) {
    %c0_i32 = arith.constant 0 : i32
    %c0_i32_0 = arith.constant 0 : i32
    %c0_i32_1 = arith.constant 0 : i32
    return %c0_i32, %c0_i32_0 : i32, i32
  }
  func.func @transform_4(%arg0: i32) -> (i32, i32) {
    %c0_i32 = arith.constant 0 : i32
    %c0_i32_0 = arith.constant 0 : i32
    %c0_i32_1 = arith.constant 0 : i32
    return %c0_i32, %c0_i32_0 : i32, i32
  }
  func.func @transform_5(%arg0: i32) -> (i32, i32) {
    %c0_i32 = arith.constant 0 : i32
    %c0_i32_0 = arith.constant 0 : i32
    return %arg0, %c0_i32 : i32, i32
  }
}

</mosaic_0001>

<bundles_post_ra>
// kernel: tpu_custom_call.1
= control target key start
LH: loop header
LB: loop body
LE: loop exit
PB: predicated region body
PF: predicated region fallthrough
CT: control target
= control target key end

     0   :  { %vm31_vm0 = vcmask 261120   ;;  %s286_s0 = inlined_call_operand.vmem [shape: f32[16,32], index: 0, kind: input, shape index: {}]   ;;  %s287_s1 = inlined_call_operand.vmem [shape: f32[32,128], index: 1, kind: input, shape index: {}]   ;;  %s288_s2 = inlined_call_operand.vmem [shape: f32[1,128], index: 2, kind: input, shape index: {}]   ;;  %s289_s3 = inlined_call_operand.vmem [shape: f32[128,16], index: 3, kind: input, shape index: {}]   ;;  %s290_s4 = inlined_call_operand.vmem [shape: f32[1,16], index: 4, kind: input, shape index: {}]   ;;  %s291_s5 = inlined_call_operand.hbm [shape: f32[16,16], index: 5, kind: output, shape index: {}]  }
   0x1   :  { %v26_v0 = vld [vmem:[%s287_s1 + $0x18] sm:$0xff]  ;;  %v25_v1 = vld [vmem:[%s287_s1 + $0x10] sm:$0xff]  ;;  %v24_v2 = vld [vmem:[%s287_s1 + $0x8] sm:$0xff] }
   0x2   :  { %50 = vmatpush.msra.mxu0 %v26_v0  ;;  %v78_v3 = vld [vmem:[%s289_s3 + $0x78] sm:$0xff]  ;;  %v77_v4 = vld [vmem:[%s289_s3 + $0x70] sm:$0xff]  ;;  %v23_v5 = vld [vmem:[%s287_s1] sm:$0xff] }
   0x3   :  { %83 = vmatpush.msra.mxu1 %v78_v3  ;;  %v76_v6 = vld [vmem:[%s289_s3 + $0x68] sm:$0xff]  ;;  %129 = vmatpush.msra.mxu2 %v78_v3  ;;  %v21_v7 = vld [vmem:[%s286_s0] sm:$0xff] }
   0x4   :  { %51 = vmatpush.msra.mxu0 %v25_v1  ;;  %v75_v8 = vld [vmem:[%s289_s3 + $0x60] sm:$0xff] }
   0x5   :  { %84 = vmatpush.msra.mxu1 %v77_v4  ;;  %130 = vmatpush.msra.mxu2 %v77_v4 }
   0x6   :  { %52 = vmatpush.msra.mxu0 %v24_v2 }
   0x7   :  { %85 = vmatpush.msra.mxu1 %v76_v6 }
   0x8   :  { %53 = vmatpush.msra.mxu0 %v23_v5 }
   0x9   :  { %10 = vsyncpa [#allocation3], 0  ;;  %127 = vmatmul.msk.f32.vlgmr.msra.gmra.mxu0 %vm31_vm0, %v21_v7  ;;  %v74_v9 = vld [vmem:[%s289_s3 + $0x58] sm:$0xff]  ;;  %131 = vmatpush.msra.mxu2 %v76_v6  ;;  %v73_v10 = vld [vmem:[%s289_s3 + $0x50] sm:$0xff]  ;;  %vm106_vm1 = vcmask 130048   ;;  %s115_s15 = sshll.u32 %s291_s5, 4  ;;  %s116_s15 = int_to_ptr.hbm [resolvable:$true] %s115_s15 }
   0xa   :  { %86 = vmatpush.msra.mxu1 %v75_v8  ;;  %v72_v11 = vld [vmem:[%s289_s3 + $0x48] sm:$0xff]  ;;  %v71_v13 = vld [vmem:[%s289_s3 + $0x40] sm:$0xff]  ;;  %v70_v14 = vld [vmem:[%s289_s3 + $0x38] sm:$0xff]  ;;  %s177_s16 = smov 128   ;;  %s178_s17 = smov 8  }
   0xb   :  { %132 = vmatpush.msra.mxu2 %v75_v8  ;;  %v22_v12 = vld [vmem:[%s286_s0 + $0x8] sm:$0xff]  ;;  %v69_v15 = vld [vmem:[%s289_s3 + $0x30] sm:$0xff]  ;;  %v67_v17 = vld [vmem:[%s289_s3 + $0x20] sm:$0xff] }
   0xc   :  { %87 = vmatpush.msra.mxu1 %v74_v9  ;;  %v68_v16 = vld [vmem:[%s289_s3 + $0x28] sm:$0xff]  ;;  %v66_v18 = vld [vmem:[%s289_s3 + $0x18] sm:$0xff]  ;;  %v65_v19 = vld [vmem:[%s289_s3 + $0x10] sm:$0xff] }
   0xd   :  { %133 = vmatpush.msra.mxu2 %v74_v9  ;;  %v64_v20 = vld [vmem:[%s289_s3 + $0x8] sm:$0xff]  ;;  %v63_v21 = vld [vmem:[%s289_s3] sm:$0xff]  ;;  %s176_s3 = smov [#allocation2]  }
   0xe   :  { %88 = vmatpush.msra.mxu1 %v73_v10  ;;  %v148_v22 = vld [vmem:[%s288_s2] ss:$0 sm:$0xff]  ;;  %s113_s13 = sshll.u32 %s176_s3, 4  ;;  %s114_s13 = int_to_ptr.vmem [resolvable:$true] %s113_s13 }
   0xf   :  { %134 = vmatpush.msra.mxu2 %v73_v10  ;;  %v149_v29 = vld [vmem:[%s290_s4] ss:$0 sm:$0xff] }
  0x10   :  { %89 = vmatpush.msra.mxu1 %v72_v11 }
  0x11   :  { %128 = vmatmul.msk.f32.gmra.mxu0 %vm31_vm0, %v22_v12  ;;  %135 = vmatpush.msra.mxu2 %v72_v11 }
  0x12   :  { %90 = vmatpush.msra.mxu1 %v71_v13 }
  0x13   :  { %136 = vmatpush.msra.mxu2 %v71_v13 }
  0x14   :  { %91 = vmatpush.msra.mxu1 %v70_v14 }
  0x15   :  { %137 = vmatpush.msra.mxu2 %v70_v14 }
  0x16   :  { %92 = vmatpush.msra.mxu1 %v69_v15 }
  0x17   :  { %138 = vmatpush.msra.mxu2 %v69_v15 }
  0x18   :  { %93 = vmatpush.msra.mxu1 %v68_v16 }
  0x19   :  { %139 = vmatpush.msra.mxu2 %v68_v16 }
  0x1a   :  { %94 = vmatpush.msra.mxu1 %v67_v17 }
  0x1b   :  { %140 = vmatpush.msra.mxu2 %v67_v17 }
  0x1c   :  { %95 = vmatpush.msra.mxu1 %v66_v18 }
  0x1d   :  { %141 = vmatpush.msra.mxu2 %v66_v18 }
  0x1e   :  { %96 = vmatpush.msra.mxu1 %v65_v19 }
  0x1f   :  { %142 = vmatpush.msra.mxu2 %v65_v19 }
  0x20   :  { %97 = vmatpush.msra.mxu1 %v64_v20 }
  0x21   :  { %143 = vmatpush.msra.mxu2 %v64_v20 }
  0x22   :  { %98 = vmatpush.msra.mxu1 %v63_v21 }
  0x23   :  { %144 = vmatpush.msra.mxu2 %v63_v21 }
  0x86   :  { %v55_v23 = vpop.f32.mrf.mxu0 }
  0x87   :  { %v56_v24 = vadd.f32 %v148_v22, %v55_v23 }
  0x89   :  { %v61_v25 = vmax.f32 %v56_v24, 0.0 }
  0x8b   :  { %99 = vmatmul.f32.vlgmr.msra.gmra.mxu1 %v61_v25 }
  0x8e   :  { %v58_v26 = vpop.f32.mrf.mxu0 }
  0x8f   :  { %v59_v27 = vadd.f32 %v148_v22, %v58_v26 }
  0x91   :  { %v62_v28 = vmax.f32 %v59_v27, 0.0 }
  0x93   :  { %102 = vmatmul.f32.vlgmr.msra.gmra.mxu2 %v62_v28 }
 0x108   :  { %v100_v30 = vpop.f32.mrf.mxu1 }
 0x109   :  { %v101_v31 = vadd.f32 %v149_v29, %v100_v30 }
 0x10b   :  { %107 = vst.msk [vmem:[#allocation2] sm:$0xff] %vm106_vm1, %v101_v31 }
 0x116   :  { %v103_v32 = vpop.f32.mrf.mxu2 }
 0x117   :  { %v104_v33 = vadd.f32 %v149_v29, %v103_v32 }
 0x119   :  { %108 = vst.msk [vmem:[#allocation2 + $0x8] sm:$0xff] %vm106_vm1, %v104_v33 }
 0x11a   :  { %121 = dma.vmem_to_hbm [thread:$0]  %s114_s13, 256, %s116_s15, [#allocation3], %s177_s16, %s177_s16, %s178_s17  }
 0x11b   :  { %174 = dma.done.wait [#allocation3], 256  }
 0x11c   :  { %175 = vsyncadd [#allocation3], 4294967040 }
 0x11d   :  { %126 = vsyncpa [#allocation3], 1 }

</bundles_post_ra>
